<compile_context>
chip_gen: v7x
topology: tpu7x:2x2x1
jax: 0.10.0
libtpu: 0.0.40
codegen_flags: <defaults>
</compile_context>

<pallas_src>
import jax
import jax.numpy as jnp
from jax.experimental import pallas as pl
from jax.experimental.pallas import tpu as pltpu


# --------------------------------------------------------------------------- #
# Kernel
# --------------------------------------------------------------------------- #
def _uwd_kernel(x_ref, sig_ref, out_ref):
    """Row layout: distribution axis (reduced) on lanes, stamps on sublanes.

    x_ref: (ts, W)   sig_ref: (ts, 1)   out_ref: (ts, W)
    """
    sigma = jnp.abs(sig_ref[...])                             # (ts, 1)
    neg_inv_two_var = -pl.reciprocal(2.0 * sigma * sigma)     # (ts, 1) per-row scalar
    x = x_ref[...]                                            # (ts, W)
    e = (x * x) * neg_inv_two_var                             # exponent, <= 0
    # Row-max subtraction: coefficient & shift cancel in the normalisation, so the
    # distribution is unchanged, but max weight == 1 -> denom >= 1 (no 0/0 NaNs).
    e = e - jnp.max(e, axis=1, keepdims=True)
    w = jnp.exp(e)                                            # only per-element EUP op
    denom = jnp.sum(w, axis=1, keepdims=True)                 # (ts, 1) lane reduce (XLU)
    out_ref[...] = (w * pl.reciprocal(denom)).astype(out_ref.dtype)


# --------------------------------------------------------------------------- #
# Wrapper
# --------------------------------------------------------------------------- #
def _round_up(n, m):
    return ((n + m - 1) // m) * m


def _round_down_pos(n, m):
    return max(m, (n // m) * m)


def _reference_jax(x, sigma):
    sigma = jnp.abs(sigma)
    w = 1.0 / jnp.sqrt(2.0 * jnp.pi * sigma ** 2) * jnp.exp(-(x ** 2) / (2.0 * sigma ** 2))
    return w / jnp.sum(w, axis=1, keepdims=True)


def user_week_distribution(
    x,
    sigma,
    *,
    out_dtype=None,
    target_block_bytes=2 * 1024 * 1024,     # ~2 MiB of x per block (1-4 MiB sweet spot)
    vmem_budget_bytes=24 * 1024 * 1024,     # all double-buffered blocks, < 32 MiB scoped
    min_pipeline_steps=8,                   # force pipelining / 2-TC sharding on big inputs
    pipeline_threshold_bytes=4 * 1024 * 1024,
):
    """x: (stamp_num, width) f32; sigma: (stamp_num, 1) f32 -> (stamp_num, width)."""
    S, W = x.shape
    assert sigma.shape == (S, 1), f"sigma must be ({S}, 1), got {sigma.shape}"
    out_dtype = x.dtype if out_dtype is None else out_dtype

    x_row_bytes = W * jnp.dtype(x.dtype).itemsize
    out_row_bytes = W * jnp.dtype(out_dtype).itemsize
    # A (ts, 1) sigma block pads to 128 lanes in VMEM -> 128 * itemsize bytes per row.
    sig_row_bytes = 128 * jnp.dtype(sigma.dtype).itemsize
    # Per row of block, double-buffered: x + out + sigma.
    per_row_pipeline_bytes = 2 * (x_row_bytes + out_row_bytes + sig_row_bytes)

    if per_row_pipeline_bytes * 8 > vmem_budget_bytes:
        # TODO(synk): extremely wide rows need a width-tiled two-pass kernel
        # (accumulate denominators, then normalise); fall back to plain JAX.
        return _reference_jax(x, sigma).astype(out_dtype)

    # Tile size along the stamp axis (multiple of 8 sublanes).
    ts = min(
        _round_down_pos(target_block_bytes // x_row_bytes, 8),   # ~2 MiB of x per block
        _round_down_pos(vmem_budget_bytes // per_row_pipeline_bytes, 8),  # VMEM clamp
        _round_up(S, 8),                                         # never exceed the array
    )
    # Never run a multi-MiB problem as a single grid step: no pipelining and one
    # idle TensorCore on v7x.  Small problems stay single-step (per-step overhead).
    if S * (x_row_bytes + out_row_bytes) > pipeline_threshold_bytes:
        ts = min(ts, max(8, _round_up(pl.cdiv(S, min_pipeline_steps), 8)))

    grid = (pl.cdiv(S, ts),)

    return pl.pallas_call(
        _uwd_kernel,
        out_shape=jax.ShapeDtypeStruct((S, W), out_dtype),
        grid=grid,
        in_specs=[
            pl.BlockSpec((ts, W), lambda i: (i, 0)),   # full-width rows: contiguous DMA
            pl.BlockSpec((ts, 1), lambda i: (i, 0)),
        ],
        out_specs=pl.BlockSpec((ts, W), lambda i: (i, 0)),
        compiler_params=pltpu.CompilerParams(
            dimension_semantics=("parallel",),          # v7x: shard stamp axis over 2 TCs
            vmem_limit_bytes=32 * 1024 * 1024,          # raise v5e's 16 MiB default; <=v7x phys
        ),
    )(x, sigma)


# --------------------------------------------------------------------------- #
# Self-test
# --------------------------------------------------------------------------- #
def _check(x, sigma, atol=1e-5, **kw):
    out = jax.block_until_ready(user_week_distribution(x, sigma, **kw))
    ref = _reference_jax(x, sigma)
    assert out.shape == x.shape, (out.shape, x.shape)
    assert jnp.allclose(out.astype(jnp.float32), ref, atol=atol, rtol=1e-3), "mismatch vs reference"
    assert jnp.allclose(jnp.sum(out.astype(jnp.float32), axis=1),
                        jnp.ones((x.shape[0],)), atol=max(atol, 1e-5) * x.shape[1])
    return out


if __name__ == "__main__":
    key = jax.random.PRNGKey(0)

    def make_inputs(key, S, W):
        kx, ks, kq = jax.random.split(key, 3)
        x = jax.random.normal(kx, (S, W), dtype=jnp.float32)
        # |sigma| in [0.5, 1.5], with random signs to exercise the abs().
        mag = 0.5 + jax.random.uniform(ks, (S, 1), dtype=jnp.float32)
        sign = jnp.where(jax.random.uniform(kq, (S, 1)) < 0.5, -1.0, 1.0)
        return x, mag * sign

    k1, k2, k3, k4 = jax.random.split(key, 4)

    # Case 1: the module's typical shape — a small per-stamp week distribution.
    x, sigma = make_inputs(k1, 8, 7)
    _check(x, sigma)

    # Case 2: more stamps, modest width (default tiling -> single contiguous block).
    x, sigma = make_inputs(k2, 2048, 24)
    _check(x, sigma)

    # Case 3: same data, small target block size to exercise the multi-step grid path.
    _check(x, sigma, target_block_bytes=64 * 1024)

    # Case 4: wider distribution axis (lane-dense rows).
    x, sigma = make_inputs(k3, 64, 256)
    _check(x, sigma)

    # Case 5: bf16 output mode (f32 compute, bf16 store).
    x, sigma = make_inputs(k4, 16, 7)
    _check(x, sigma, atol=1e-2, out_dtype=jnp.bfloat16)

    print("KERNEL_OK")
</pallas_src>

<mosaic_0001>
module attributes {stable_mosaic.version = 11 : i64} {
  func.func @_uwd_kernel(%arg0: i32, %arg1: memref<8x7xf32, #tpu.memory_space<vmem>>, %arg2: memref<8x1xf32, #tpu.memory_space<vmem>>, %arg3: memref<8x7xf32, #tpu.memory_space<vmem>>) attributes {dimension_semantics = [#tpu.dimension_semantics<parallel>], iteration_bounds = array<i64: 1>, scalar_prefetch = 0 : i64, scratch_operands = 0 : i64, tpu.core_type = #tpu.core_type<tc>, window_params = [{transform_indices = @transform_0, window_bounds = array<i64: 8, 7>}, {transform_indices = @transform_1, window_bounds = array<i64: 8, 1>}, {transform_indices = @transform_2, window_bounds = array<i64: 8, 7>}]} {
    %c0 = arith.constant 0 : index
    %c0_0 = arith.constant 0 : index
    %0 = vector.load %arg2[%c0, %c0_0] : memref<8x1xf32, #tpu.memory_space<vmem>>, vector<8x1xf32>
    %1 = math.absf %0 : vector<8x1xf32>
    %cst = arith.constant 2.000000e+00 : f32
    %2 = vector.broadcast %cst : f32 to vector<8x1xf32>
    %3 = arith.mulf %2, %1 : vector<8x1xf32>
    %4 = arith.mulf %3, %1 : vector<8x1xf32>
    %5 = tpu.reciprocal %4 : vector<8x1xf32> -> vector<8x1xf32>
    %cst_1 = arith.constant 0.000000e+00 : f32
    %6 = vector.broadcast %cst_1 : f32 to vector<8x1xf32>
    %7 = arith.subf %6, %5 : vector<8x1xf32>
    %c0_2 = arith.constant 0 : index
    %c0_3 = arith.constant 0 : index
    %8 = vector.load %arg1[%c0_2, %c0_3] : memref<8x7xf32, #tpu.memory_space<vmem>>, vector<8x7xf32>
    %9 = arith.mulf %8, %8 : vector<8x7xf32>
    %10 = vector.broadcast %7 : vector<8x1xf32> to vector<8x7xf32>
    %11 = arith.mulf %9, %10 : vector<8x7xf32>
    %cst_4 = arith.constant dense<0xFF800000> : vector<8xf32>
    %12 = vector.multi_reduction <maximumf>, %11, %cst_4 [1] : vector<8x7xf32> to vector<8xf32>
    %13 = vector.shape_cast %12 : vector<8xf32> to vector<8x1xf32>
    %14 = vector.broadcast %13 : vector<8x1xf32> to vector<8x7xf32>
    %15 = arith.subf %11, %14 : vector<8x7xf32>
    %16 = math.exp %15 : vector<8x7xf32>
    %cst_5 = arith.constant dense<0.000000e+00> : vector<8xf32>
    %17 = vector.multi_reduction <add>, %16, %cst_5 [1] : vector<8x7xf32> to vector<8xf32>
    %18 = vector.shape_cast %17 : vector<8xf32> to vector<8x1xf32>
    %19 = tpu.reciprocal %18 : vector<8x1xf32> -> vector<8x1xf32>
    %20 = vector.broadcast %19 : vector<8x1xf32> to vector<8x7xf32>
    %21 = arith.mulf %16, %20 : vector<8x7xf32>
    %c0_6 = arith.constant 0 : index
    %c0_7 = arith.constant 0 : index
    %22 = vector.load %arg3[%c0_6, %c0_7] : memref<8x7xf32, #tpu.memory_space<vmem>>, vector<8x7xf32>
    tpu.vector_store %arg3[%c0_6, %c0_7], %21 {strides = array<i32>} : memref<8x7xf32, #tpu.memory_space<vmem>>, vector<8x7xf32>,
    return
  }
  func.func @transform_0(%arg0: i32) -> (i32, i32) {
    %c0_i32 = arith.constant 0 : i32
    %c0_i32_0 = arith.constant 0 : i32
    return %arg0, %c0_i32 : i32, i32
  }
  func.func @transform_1(%arg0: i32) -> (i32, i32) {
    %c0_i32 = arith.constant 0 : i32
    %c0_i32_0 = arith.constant 0 : i32
    return %arg0, %c0_i32 : i32, i32
  }
  func.func @transform_2(%arg0: i32) -> (i32, i32) {
    %c0_i32 = arith.constant 0 : i32
    %c0_i32_0 = arith.constant 0 : i32
    return %arg0, %c0_i32 : i32, i32
  }
}

</mosaic_0001>

<bundles_post_ra>
// kernel: tpu_custom_call.1
= control target key start
LH: loop header
LB: loop body
LE: loop exit
PB: predicated region body
PF: predicated region fallthrough
CT: control target
= control target key end

     0   :  { %s124_s0 = inlined_call_operand.vmem [shape: f32[8,7], index: 0, kind: input, shape index: {}]   ;;  %s125_s1 = inlined_call_operand.vmem [shape: f32[8,1], index: 1, kind: input, shape index: {}]   ;;  %s126_s2 = inlined_call_operand.hbm [shape: f32[8,7], index: 2, kind: output, shape index: {}]  }
   0x1   :  { %v12_v0 = vld [vmem:[%s125_s1] sm:$0xff] }
   0x2   :  { %7 = vsyncpa [#allocation3], 0  ;;  %v86_v1 = vmov 0   ;;  %v13_v2 = vand.u32 2147483647, %v12_v0  ;;  %v18_v7 = vld [vmem:[%s124_s0] sm:$0xff] }
   0x3   :  { %55 = vset.pattern.permute.xlu0 %v86_v1  ;;  %v19_v8 = vmul.f32 %v18_v7, %v18_v7  ;;  %vm26_vm0 = vcmask 56320   ;;  %s87_s1 = smov [#allocation2]  }
   0x4   :  { %v14_v3 = vmul.f32 2.0, %v13_v2  ;;  %s45_s13 = sshll.u32 %s87_s1, 4  ;;  %s46_s13 = int_to_ptr.vmem [resolvable:$true] %s45_s13 }
   0x5   :  { %s62_s0 = scalar_lea.vmem %s46_s13, 128  ;;  %p67_p1 = scmp.lt.s32.totalorder %s46_s13, %s46_s13 }
   0x6   :  { %v15_v4 = vmul.f32 %v14_v3, %v13_v2  ;;  %p63_p0 = scmp.ne.s32.totalorder %s46_s13, %s62_s0  ;;  %p68_p2 = scmp.lt.s32.totalorder %s62_s0, %s62_s0 }
   0x8   :  { %56 = vrcp.f32 %v15_v4  ;;  %p69_p3 = por %p68_p2, %p67_p1 }
   0xa   :  { %p70_p4 = pnand %p69_p3, %p63_p0 }
  0x12   :  { %v57_v5 = vpop.eup %56 }
  0x13   :  { %v17_v6 = vsub.f32 0.0, %v57_v5 }
  0x15   :  { %22 = vperm.xlu0 %55, %v17_v6  }
  0x94   :  { %v23_v9 = vpop.permute.xlu0 %22 }
  0x95   :  { %v25_v10 = vmul.f32 %v23_v9, %v19_v8 }
  0x97   :  { %v27_v11 = vsel %vm26_vm0, %v25_v10, -inf }
  0x98   :  { %28 = vmax.xlane.f32.xlu0 %v27_v11 }
 0x125   :  { %v29_v12 = vpop.xlane.xlu0 %28 }
 0x126   :  { %v30_v13 = vsub.f32 %v25_v10, %v29_v12 }
 0x128   :  { %v31_v14 = vmul.f32 1.442695, %v30_v13 }
 0x12a   :  { %58 = vpow2.f32 %v31_v14 }
 0x134   :  { %v59_v15 = vpop.eup %58 }
 0x135   :  { %v33_v16 = vsel %vm26_vm0, %v59_v15, 0.0 }
 0x136   :  { %34 = vadd.xlane.f32.xlu1 %v33_v16 }
 0x1c3   :  { %v35_v17 = vpop.xlane.xlu1 %34 }
 0x1c4   :  { %60 = vrcp.f32 %v35_v17 }
 0x1ce   :  { %v61_v18 = vpop.eup %60 }
 0x1cf   :  { %v37_v19 = vmul.f32 %v61_v18, %v59_v15 }
 0x1d1   :  { %38 = vst.msk [vmem:[#allocation2] sm:$0xff] %vm26_vm0, %v37_v19 }
 0x1d2   :  { %73 = shalt.err (!%p70_p4)
}
 0x1d3   :  { %s74_s16 = scalar_lea.hbm %s126_s2, 128 }
 0x1d4   :  { %p75_p5 = scmp.ne.s32.totalorder %s126_s2, %s74_s16  ;;  %p78_p6 = scmp.lt.u32.totalorder %s74_s16, %s126_s2 }
 0x1d6   :  { %p80_p7 = pnand %p78_p6, %p75_p5 }
 0x1d8   :  { %83 = shalt.err (!%p80_p7)
}
 0x1d9   :  { %48 = dma.vmem_to_hbm [thread:$0]  %s46_s13, 128, %s126_s2, [#allocation3]  }
 0x1da   :  { %84 = dma.done.wait [#allocation3], 128  }
 0x1db   :  { %85 = vsyncadd [#allocation3], 4294967168 }
 0x1dc   :  { %52 = vsyncpa [#allocation3], 1 }

</bundles_post_ra>
